<compile_context>
chip_gen: v5e
topology: v5e:2x2
jax: 0.10.0
libtpu: 0.0.40
codegen_flags: <defaults>
</compile_context>

<pallas_src>
import functools
import math

import jax
import jax.numpy as jnp
import numpy as np
from jax import lax
from jax.experimental import pallas as pl
from jax.experimental.pallas import tpu as pltpu

_MIB = 1024 * 1024


# --------------------------------------------------------------------------
# Hardware / budget helpers
# --------------------------------------------------------------------------
def _physical_vmem_bytes():
    """Physical VMEM per TensorCore; conservative 64 MiB fallback (v7x)."""
    try:
        info = pltpu.get_tpu_info()
        cap = getattr(info, "vmem_capacity_bytes", None)
        if cap:
            return int(cap)
    except Exception:
        pass
    return 64 * _MIB


def _divisors(L, cap):
    cands = [t for t in (1024, 512, 256, 128, 64, 32, 16, 8) if t <= cap and t <= L and L % t == 0]
    return cands if cands else [L]


def _scored_footprint(tq, L, D, in_bytes, score_bytes, has_mask, mask_q_full):
    kv = 2 * 2 * L * D * in_bytes               # K and V, double-buffered, VMEM-resident
    qb = 2 * tq * D * in_bytes                  # Q tile
    ob = 2 * tq * D * in_bytes                  # output tile
    sb = 2 * tq * L * score_bytes               # score writeback tile
    mb = (2 * (tq if mask_q_full else 1) * L) if has_mask else 0
    tmp = 3 * tq * L * 4                        # live f32 softmax intermediates
    return kv + qb + ob + sb + mb + tmp


def _flash_footprint(tq, tk, D, in_bytes, has_mask, mask_q_full):
    kv = 2 * 2 * tk * D * in_bytes
    qb = 2 * tq * D * in_bytes
    ob = 2 * tq * D * in_bytes
    mb = (2 * (tq if mask_q_full else 1) * tk) if has_mask else 0
    scratch = tq * D * 4 + 2 * tq * 4
    tmp = 3 * tq * tk * 4
    return kv + qb + ob + mb + scratch + tmp


def _vmem_limit(footprint, phys):
    want = max(32 * _MIB, footprint + footprint // 4 + 4 * _MIB)
    return int(max(16 * _MIB, min(phys - 4 * _MIB, want)))


# --------------------------------------------------------------------------
# Mask handling (no L^2 materialization in the wrapper)
# --------------------------------------------------------------------------
def _normalize_mask(mask, B, H, L):
    """Cast to int8 and left-pad dims to 4, keeping original broadcast dims."""
    m = jnp.asarray(mask)
    if m.ndim > 4:
        raise ValueError("mask must have at most 4 dims")
    m = m.reshape((1,) * (4 - m.ndim) + m.shape)
    for ax, full in enumerate((B, H, L, L)):
        if m.shape[ax] not in (1, full):
            raise ValueError(f"mask dim {ax} = {m.shape[ax]} not broadcastable to {full}")
    return (m != 0).astype(jnp.int8)


# --------------------------------------------------------------------------
# Kernels
# --------------------------------------------------------------------------
def _attn_scored_kernel(*refs, has_mask):
    if has_mask:
        q_ref, k_ref, v_ref, m_ref, o_ref, s_ref = refs
    else:
        q_ref, k_ref, v_ref, o_ref, s_ref = refs
        m_ref = None

    d = q_ref.shape[-1]
    # Fold 1/sqrt(d) into the small (TQ, D) Q tile (native dtype -> MXU bf16 ok).
    q = q_ref[...] * jnp.asarray(1.0 / math.sqrt(d), dtype=q_ref.dtype)

    # score = q @ k^T: contract last dims of both operands (no K transpose copy).
    score = lax.dot_general(
        q, k_ref[...],
        dimension_numbers=(((1,), (1,)), ((), ())),
        preferred_element_type=jnp.float32,
    )  # (TQ, L) f32

    if m_ref is not None:
        # mask ref may be (1, L), (TQ, 1), (1, 1) or (TQ, L); broadcasts in-kernel.
        score = jnp.where(m_ref[...] == 0, jnp.float32(-10000.0), score)

    # Numerically stable softmax along key axis.
    mx = jnp.max(score, axis=-1, keepdims=True)
    p = jnp.exp(score - mx)
    denom = jnp.sum(p, axis=-1, keepdims=True)
    inv = pl.reciprocal(denom, approx=True)           # EUP slot
    inv = inv * (jnp.float32(2.0) - denom * inv)      # Newton step -> ~exact
    attn_f32 = p * inv

    # Cast once; reuse for the P.V matmul when dtypes line up.
    if s_ref.dtype == v_ref.dtype:
        a = attn_f32.astype(s_ref.dtype)
        s_ref[...] = a
        mm_in = a
    else:
        s_ref[...] = attn_f32.astype(s_ref.dtype)
        mm_in = attn_f32.astype(v_ref.dtype)

    out = jnp.dot(mm_in, v_ref[...], preferred_element_type=jnp.float32)
    o_ref[...] = out.astype(o_ref.dtype)


def _attn_flash_kernel(*refs, has_mask):
    if has_mask:
        q_ref, k_ref, v_ref, m_ref, o_ref, m_sc, l_sc, acc_sc = refs
    else:
        q_ref, k_ref, v_ref, o_ref, m_sc, l_sc, acc_sc = refs
        m_ref = None

    kv_i = pl.program_id(3)

    @pl.when(kv_i == 0)
    def _():
        m_sc[...] = jnp.full_like(m_sc, -jnp.inf)
        l_sc[...] = jnp.zeros_like(l_sc)
        acc_sc[...] = jnp.zeros_like(acc_sc)

    d = q_ref.shape[-1]
    q = q_ref[...] * jnp.asarray(1.0 / math.sqrt(d), dtype=q_ref.dtype)

    s = lax.dot_general(
        q, k_ref[...],
        dimension_numbers=(((1,), (1,)), ((), ())),
        preferred_element_type=jnp.float32,
    )  # (TQ, TK) f32

    if m_ref is not None:
        s = jnp.where(m_ref[...] == 0, jnp.float32(-10000.0), s)

    m_prev = m_sc[...]
    m_new = jnp.maximum(m_prev, jnp.max(s, axis=-1, keepdims=True))
    alpha = jnp.exp(m_prev - m_new)
    p = jnp.exp(s - m_new)
    l_sc[...] = alpha * l_sc[...] + jnp.sum(p, axis=-1, keepdims=True)
    acc_sc[...] = alpha * acc_sc[...] + jnp.dot(
        p.astype(v_ref.dtype), v_ref[...], preferred_element_type=jnp.float32)
    m_sc[...] = m_new

    @pl.when(kv_i == pl.num_programs(3) - 1)
    def _():
        denom = l_sc[...]
        inv = pl.reciprocal(denom, approx=True)
        inv = inv * (jnp.float32(2.0) - denom * inv)
        o_ref[...] = (acc_sc[...] * inv).astype(o_ref.dtype)


# --------------------------------------------------------------------------
# Wrapper
# --------------------------------------------------------------------------
def scale_dot_product_attention(q, k, v, mask=None, *, return_score=True,
                                score_dtype=None, block_q=None, block_k=None):
    """Pallas implementation of ScaleDotProductAttention.forward.

    q, k, v: [B, H, L, D]; mask (optional): broadcastable to [B, H, L, L].
    return_score=True  -> (output [B,H,L,D], score [B,H,L,L])  (module semantics)
    return_score=False -> output only, flash-style (no L^2 HBM traffic).
    """
    B, H, L, D = q.shape
    in_bytes = jnp.dtype(q.dtype).itemsize
    score_dtype = jnp.dtype(score_dtype) if score_dtype is not None else jnp.dtype(q.dtype)
    score_bytes = score_dtype.itemsize

    has_mask = mask is not None
    mask_i8 = _normalize_mask(mask, B, H, L) if has_mask else None
    if has_mask:
        mB, mH, mQ, mK = mask_i8.shape
        mask_q_full = (mQ == L)
        mask_k_full = (mK == L)
    else:
        mB = mH = mQ = mK = 1
        mask_q_full = mask_k_full = False

    phys = _physical_vmem_bytes()
    budget = (phys * 3) // 4

    cost = pl.CostEstimate(
        flops=4 * B * H * L * L * D,
        transcendentals=B * H * L * L,
        bytes_accessed=(q.size + k.size + v.size) * in_bytes
        + B * H * L * D * in_bytes
        + (B * H * L * L * score_bytes if return_score else 0)
        + (mask_i8.size if has_mask else 0),
    )

    if return_score:
        # ---------------- scored path: K/V resident, score written back -----
        min_tq = 32 if (has_mask and mask_q_full) else 8   # int8 (32,128) tiling
        cands = _divisors(L, 512)
        preferred = [t for t in cands if t >= min_tq] or cands
        if block_q is not None and L % block_q == 0:
            tq = block_q
        else:
            tq = preferred[-1]
            for t in preferred:
                if _scored_footprint(t, L, D, in_bytes, score_bytes,
                                     has_mask, mask_q_full) <= budget:
                    tq = t
                    break
        nq = L // tq
        fp = _scored_footprint(tq, L, D, in_bytes, score_bytes, has_mask, mask_q_full)

        q_spec = pl.BlockSpec((None, None, tq, D), lambda b, h, i: (b, h, i, 0))
        kv_spec = pl.BlockSpec((None, None, L, D), lambda b, h, i: (b, h, 0, 0))
        o_spec = pl.BlockSpec((None, None, tq, D), lambda b, h, i: (b, h, i, 0))
        s_spec = pl.BlockSpec((None, None, tq, L), lambda b, h, i: (b, h, i, 0))

        in_specs = [q_spec, kv_spec, kv_spec]
        args = (q, k, v)
        if has_mask:
            m_spec = pl.BlockSpec(
                (None, None, tq if mask_q_full else 1, mK),
                lambda b, h, i, _mB=mB, _mH=mH, _qf=mask_q_full: (
                    b if _mB > 1 else 0, h if _mH > 1 else 0, i if _qf else 0, 0),
            )
            in_specs.append(m_spec)
            args = args + (mask_i8,)

        out_shape = (
            jax.ShapeDtypeStruct((B, H, L, D), q.dtype),
            jax.ShapeDtypeStruct((B, H, L, L), score_dtype),
        )
        kernel = functools.partial(_attn_scored_kernel, has_mask=has_mask)

        return pl.pallas_call(
            kernel,
            out_shape=out_shape,
            grid_spec=pltpu.PrefetchScalarGridSpec(
                num_scalar_prefetch=0,
                grid=(B, H, nq),
                in_specs=in_specs,
                out_specs=(o_spec, s_spec),
            ),
            compiler_params=pltpu.CompilerParams(
                # q-tile axis "arbitrary": keeps megacore (v7x) sharding on B/H so
                # the VMEM-resident K/V blocks are fetched once per (b, h).
                dimension_semantics=("parallel", "parallel", "arbitrary"),
                vmem_limit_bytes=_vmem_limit(fp, phys),
            ),
            cost_estimate=cost,
        )(*args)

    # -------------------- flash path: no score output, K/V tiled ------------
    tk_cands = _divisors(L, 512)
    tq_cands = _divisors(L, 512)
    tq, tk = tq_cands[-1], tk_cands[-1]
    done = False
    for tk_c in tk_cands:
        for tq_c in tq_cands:
            if _flash_footprint(tq_c, tk_c, D, in_bytes, has_mask, mask_q_full) <= budget:
                tq, tk = tq_c, tk_c
                done = True
                break
        if done:
            break
    if block_q is not None and L % block_q == 0:
        tq = block_q
    if block_k is not None and L % block_k == 0:
        tk = block_k
    nq, nk = L // tq, L // tk
    fp = _flash_footprint(tq, tk, D, in_bytes, has_mask, mask_q_full)

    q_spec = pl.BlockSpec((None, None, tq, D), lambda b, h, i, j: (b, h, i, 0))
    kv_spec = pl.BlockSpec((None, None, tk, D), lambda b, h, i, j: (b, h, j, 0))
    o_spec = pl.BlockSpec((None, None, tq, D), lambda b, h, i, j: (b, h, i, 0))

    in_specs = [q_spec, kv_spec, kv_spec]
    args = (q, k, v)
    if has_mask:
        m_spec = pl.BlockSpec(
            (None, None, tq if mask_q_full else 1, tk if mask_k_full else 1),
            lambda b, h, i, j, _mB=mB, _mH=mH, _qf=mask_q_full, _kf=mask_k_full: (
                b if _mB > 1 else 0, h if _mH > 1 else 0,
                i if _qf else 0, j if _kf else 0),
        )
        in_specs.append(m_spec)
        args = args + (mask_i8,)

    kernel = functools.partial(_attn_flash_kernel, has_mask=has_mask)

    return pl.pallas_call(
        kernel,
        out_shape=jax.ShapeDtypeStruct((B, H, L, D), q.dtype),
        grid_spec=pltpu.PrefetchScalarGridSpec(
            num_scalar_prefetch=0,
            grid=(B, H, nq, nk),
            in_specs=in_specs,
            out_specs=o_spec,
            scratch_shapes=[
                pltpu.VMEM((tq, 1), jnp.float32),   # running max
                pltpu.VMEM((tq, 1), jnp.float32),   # running denom
                pltpu.VMEM((tq, D), jnp.float32),   # output accumulator
            ],
        ),
        compiler_params=pltpu.CompilerParams(
            dimension_semantics=("parallel", "parallel", "arbitrary", "arbitrary"),
            vmem_limit_bytes=_vmem_limit(fp, phys),
        ),
        cost_estimate=cost,
    )(*args)


# --------------------------------------------------------------------------
# Reference & tests
# --------------------------------------------------------------------------
def _reference(q, k, v, mask=None):
    d = q.shape[-1]
    score = jnp.einsum("bhld,bhmd->bhlm", q, k) / math.sqrt(d)
    if mask is not None:
        score = jnp.where(mask == 0, -10000.0, score)
    score = jax.nn.softmax(score, axis=-1)
    out = jnp.einsum("bhlm,bhmd->bhld", score, v)
    return out, score


if __name__ == "__main__":
    key = jax.random.PRNGKey(0)
    kq, kk, kv, k2, k3 = jax.random.split(key, 5)

    # --- 1. small shape, unmasked, scored path -----------------------------
    B, H, L, D = 2, 2, 8, 16
    q = jax.random.normal(kq, (B, H, L, D), dtype=jnp.float32)
    k = jax.random.normal(kk, (B, H, L, D), dtype=jnp.float32)
    v = jax.random.normal(kv, (B, H, L, D), dtype=jnp.float32)

    out, score = scale_dot_product_attention(q, k, v)
    jax.block_until_ready((out, score))
    ref_out, ref_score = _reference(q, k, v)
    np.testing.assert_allclose(np.asarray(out), np.asarray(ref_out), rtol=1e-5, atol=1e-5)
    np.testing.assert_allclose(np.asarray(score), np.asarray(ref_score), rtol=1e-5, atol=1e-5)

    # --- 2. head-broadcast causal mask, two q-tiles, scored path -----------
    B2, H2, L2, D2 = 2, 2, 16, 16
    kq2, kk2, kv2 = jax.random.split(k2, 3)
    q2 = jax.random.normal(kq2, (B2, H2, L2, D2), dtype=jnp.float32)
    k2_ = jax.random.normal(kk2, (B2, H2, L2, D2), dtype=jnp.float32)
    v2 = jax.random.normal(kv2, (B2, H2, L2, D2), dtype=jnp.float32)
    causal = jnp.tril(jnp.ones((L2, L2), dtype=jnp.int32))
    mask2 = jnp.broadcast_to(causal, (B2, 1, L2, L2))   # head broadcast via index_map

    out2, score2 = scale_dot_product_attention(q2, k2_, v2, mask2, block_q=8)
    jax.block_until_ready((out2, score2))
    ref_out2, ref_score2 = _reference(q2, k2_, v2, mask2)
    np.testing.assert_allclose(np.asarray(out2), np.asarray(ref_out2), rtol=1e-5, atol=1e-5)
    np.testing.assert_allclose(np.asarray(score2), np.asarray(ref_score2), rtol=1e-5, atol=1e-5)

    # --- 3. key-padding mask [B,1,1,L] (never materialized to L*L) ---------
    lens = jnp.array([L2, 11])
    pad_mask = (jnp.arange(L2)[None, :] < lens[:, None]).astype(jnp.int32)
    pad_mask = pad_mask[:, None, None, :]                # [B, 1, 1, L]
    out3, score3 = scale_dot_product_attention(q2, k2_, v2, pad_mask)
    jax.block_until_ready((out3, score3))
    ref_out3, ref_score3 = _reference(q2, k2_, v2, pad_mask)
    np.testing.assert_allclose(np.asarray(out3), np.asarray(ref_out3), rtol=1e-5, atol=1e-5)
    np.testing.assert_allclose(np.asarray(score3), np.asarray(ref_score3), rtol=1e-5, atol=1e-5)

    # --- 4. flash (no-score) path: unmasked and padding-masked -------------
    out4 = scale_dot_product_attention(q2, k2_, v2, return_score=False,
                                       block_q=8, block_k=8)
    jax.block_until_ready(out4)
    np.testing.assert_allclose(np.asarray(out4),
                               np.asarray(_reference(q2, k2_, v2)[0]),
                               rtol=1e-5, atol=1e-5)

    out5 = scale_dot_product_attention(q2, k2_, v2, pad_mask, return_score=False,
                                       block_q=8, block_k=8)
    jax.block_until_ready(out5)
    np.testing.assert_allclose(np.asarray(out5), np.asarray(ref_out3),
                               rtol=1e-5, atol=1e-5)

    print("KERNEL_OK")
</pallas_src>

<mosaic_0001>
module attributes {stable_mosaic.version = 11 : i64} {
  func.func @_attn_scored_kernel(%arg0: i32, %arg1: i32, %arg2: i32, %arg3: memref<1x1x8x16xf32, #tpu.memory_space<vmem>>, %arg4: memref<1x1x8x16xf32, #tpu.memory_space<vmem>>, %arg5: memref<1x1x8x16xf32, #tpu.memory_space<vmem>>, %arg6: memref<1x1x8x16xf32, #tpu.memory_space<vmem>>, %arg7: memref<1x1x8x8xf32, #tpu.memory_space<vmem>>) attributes {dimension_semantics = [#tpu.dimension_semantics<parallel>, #tpu.dimension_semantics<parallel>, #tpu.dimension_semantics<arbitrary>], iteration_bounds = array<i64: 2, 2, 1>, scalar_prefetch = 0 : i64, scratch_operands = 0 : i64, tpu.core_type = #tpu.core_type<tc>, window_params = [{transform_indices = @transform_0, window_bounds = array<i64: 1, 1, 8, 16>}, {transform_indices = @transform_1, window_bounds = array<i64: 1, 1, 8, 16>}, {transform_indices = @transform_2, window_bounds = array<i64: 1, 1, 8, 16>}, {transform_indices = @transform_3, window_bounds = array<i64: 1, 1, 8, 16>}, {transform_indices = @transform_4, window_bounds = array<i64: 1, 1, 8, 8>}]} {
    %c0 = arith.constant 0 : index
    %c0_0 = arith.constant 0 : index
    %c0_1 = arith.constant 0 : index
    %c0_2 = arith.constant 0 : index
    %0 = vector.load %arg3[%c0, %c0_0, %c0_1, %c0_2] : memref<1x1x8x16xf32, #tpu.memory_space<vmem>>, vector<1x1x8x16xf32>
    %1 = vector.shape_cast %0 : vector<1x1x8x16xf32> to vector<8x16xf32>
    %cst = arith.constant 2.500000e-01 : f32
    %2 = vector.broadcast %cst : f32 to vector<8x16xf32>
    %3 = arith.mulf %1, %2 : vector<8x16xf32>
    %c0_3 = arith.constant 0 : index
    %c0_4 = arith.constant 0 : index
    %c0_5 = arith.constant 0 : index
    %c0_6 = arith.constant 0 : index
    %4 = vector.load %arg4[%c0_3, %c0_4, %c0_5, %c0_6] : memref<1x1x8x16xf32, #tpu.memory_space<vmem>>, vector<1x1x8x16xf32>
    %5 = vector.shape_cast %4 : vector<1x1x8x16xf32> to vector<8x16xf32>
    %cst_7 = arith.constant dense<0.000000e+00> : vector<8x8xf32>
    %6 = tpu.matmul %3, %5, %cst_7 {dimension_numbers = #tpu.dot_dimension_numbers<[1], [1], [0], [0], [0, 0, 1, 0], [], []>} : vector<8x16xf32>, vector<8x16xf32>, vector<8x8xf32> -> vector<8x8xf32>
    %cst_8 = arith.constant dense<0xFF800000> : vector<8xf32>
    %7 = vector.multi_reduction <maximumf>, %6, %cst_8 [1] : vector<8x8xf32> to vector<8xf32>
    %8 = vector.shape_cast %7 : vector<8xf32> to vector<8x1xf32>
    %9 = vector.broadcast %8 : vector<8x1xf32> to vector<8x8xf32>
    %10 = arith.subf %6, %9 : vector<8x8xf32>
    %11 = math.exp %10 : vector<8x8xf32>
    %cst_9 = arith.constant dense<0.000000e+00> : vector<8xf32>
    %12 = vector.multi_reduction <add>, %11, %cst_9 [1] : vector<8x8xf32> to vector<8xf32>
    %13 = vector.shape_cast %12 : vector<8xf32> to vector<8x1xf32>
    %14 = tpu.reciprocal %13 {approx = true} : vector<8x1xf32> -> vector<8x1xf32>
    %15 = arith.mulf %13, %14 : vector<8x1xf32>
    %cst_10 = arith.constant 2.000000e+00 : f32
    %16 = vector.broadcast %cst_10 : f32 to vector<8x1xf32>
    %17 = arith.subf %16, %15 : vector<8x1xf32>
    %18 = arith.mulf %14, %17 : vector<8x1xf32>
    %19 = vector.broadcast %18 : vector<8x1xf32> to vector<8x8xf32>
    %20 = arith.mulf %11, %19 : vector<8x8xf32>
    %c0_11 = arith.constant 0 : index
    %c0_12 = arith.constant 0 : index
    %c0_13 = arith.constant 0 : index
    %c0_14 = arith.constant 0 : index
    %21 = vector.load %arg7[%c0_11, %c0_12, %c0_13, %c0_14] : memref<1x1x8x8xf32, #tpu.memory_space<vmem>>, vector<1x1x8x8xf32>
    %22 = vector.shape_cast %21 : vector<1x1x8x8xf32> to vector<8x8xf32>
    %23 = vector.shape_cast %20 : vector<8x8xf32> to vector<1x1x8x8xf32>
    tpu.vector_store %arg7[%c0_11, %c0_12, %c0_13, %c0_14], %23 {strides = array<i32>} : memref<1x1x8x8xf32, #tpu.memory_space<vmem>>, vector<1x1x8x8xf32>,
    %c0_15 = arith.constant 0 : index
    %c0_16 = arith.constant 0 : index
    %c0_17 = arith.constant 0 : index
    %c0_18 = arith.constant 0 : index
    %24 = vector.load %arg5[%c0_15, %c0_16, %c0_17, %c0_18] : memref<1x1x8x16xf32, #tpu.memory_space<vmem>>, vector<1x1x8x16xf32>
    %25 = vector.shape_cast %24 : vector<1x1x8x16xf32> to vector<8x16xf32>
    %cst_19 = arith.constant dense<0.000000e+00> : vector<8x16xf32>
    %26 = tpu.matmul %20, %25, %cst_19 {dimension_numbers = #tpu.dot_dimension_numbers<[1], [0], [0], [1], [0, 0, 1, 1], [], []>} : vector<8x8xf32>, vector<8x16xf32>, vector<8x16xf32> -> vector<8x16xf32>
    %c0_20 = arith.constant 0 : index
    %c0_21 = arith.constant 0 : index
    %c0_22 = arith.constant 0 : index
    %c0_23 = arith.constant 0 : index
    %27 = vector.load %arg6[%c0_20, %c0_21, %c0_22, %c0_23] : memref<1x1x8x16xf32, #tpu.memory_space<vmem>>, vector<1x1x8x16xf32>
    %28 = vector.shape_cast %27 : vector<1x1x8x16xf32> to vector<8x16xf32>
    %29 = vector.shape_cast %26 : vector<8x16xf32> to vector<1x1x8x16xf32>
    tpu.vector_store %arg6[%c0_20, %c0_21, %c0_22, %c0_23], %29 {strides = array<i32>} : memref<1x1x8x16xf32, #tpu.memory_space<vmem>>, vector<1x1x8x16xf32>,
    return
  }
  func.func @transform_0(%arg0: i32, %arg1: i32, %arg2: i32) -> (i32, i32, i32, i32) {
    %c0_i32 = arith.constant 0 : i32
    %c0_i32_0 = arith.constant 0 : i32
    return %arg0, %arg1, %arg2, %c0_i32 : i32, i32, i32, i32
  }
  func.func @transform_1(%arg0: i32, %arg1: i32, %arg2: i32) -> (i32, i32, i32, i32) {
    %c0_i32 = arith.constant 0 : i32
    %c0_i32_0 = arith.constant 0 : i32
    %c0_i32_1 = arith.constant 0 : i32
    return %arg0, %arg1, %c0_i32, %c0_i32_0 : i32, i32, i32, i32
  }
  func.func @transform_2(%arg0: i32, %arg1: i32, %arg2: i32) -> (i32, i32, i32, i32) {
    %c0_i32 = arith.constant 0 : i32
    %c0_i32_0 = arith.constant 0 : i32
    %c0_i32_1 = arith.constant 0 : i32
    return %arg0, %arg1, %c0_i32, %c0_i32_0 : i32, i32, i32, i32
  }
  func.func @transform_3(%arg0: i32, %arg1: i32, %arg2: i32) -> (i32, i32, i32, i32) {
    %c0_i32 = arith.constant 0 : i32
    %c0_i32_0 = arith.constant 0 : i32
    return %arg0, %arg1, %arg2, %c0_i32 : i32, i32, i32, i32
  }
  func.func @transform_4(%arg0: i32, %arg1: i32, %arg2: i32) -> (i32, i32, i32, i32) {
    %c0_i32 = arith.constant 0 : i32
    %c0_i32_0 = arith.constant 0 : i32
    return %arg0, %arg1, %arg2, %c0_i32 : i32, i32, i32, i32
  }
}

</mosaic_0001>

<bundles_post_ra>
// kernel: tpu_custom_call.1
= control target key start
LH: loop header
LB: loop body
LE: loop exit
PB: predicated region body
PF: predicated region fallthrough
CT: control target
= control target key end

     0   :  { %s1208_s0 = inlined_call_operand.hbm [shape: f32[2,2,8,16], index: 0, kind: input, shape index: {}]   ;;  %s1209_s1 = inlined_call_operand.hbm [shape: f32[2,2,8,16], index: 1, kind: input, shape index: {}]   ;;  %s1210_s2 = inlined_call_operand.hbm [shape: f32[2,2,8,16], index: 2, kind: input, shape index: {}]   ;;  %s1211_s3 = inlined_call_operand.hbm [shape: f32[2,2,8,16], index: 3, kind: output, shape index: {0}]   ;;  %s1212_s4 = inlined_call_operand.hbm [shape: f32[2,2,8,8], index: 4, kind: output, shape index: {1}]  }
   0x1   :  { %1219 = sst [smem:[#allocation22_spill]] %s1209_s1 }
   0x2   :  { %10 = vsyncpa [#allocation3], 0 }
   0x3   :  { %12 = vsyncpa [#allocation3 + $0x1], 0 }
   0x4   :  { %13 = vsyncpa [#allocation6], 0 }
   0x5   :  { %15 = vsyncpa [#allocation6 + $0x1], 0 }
   0x6   :  { %16 = vsyncpa [#allocation4], 0 }
   0x7   :  { %18 = vsyncpa [#allocation4 + $0x1], 0 }
   0x8   :  { %19 = vsyncpa [#allocation10], 0 }
   0x9   :  { %21 = vsyncpa [#allocation10 + $0x1], 0  ;;  %s1006_s15 = smov 0   ;;  %s1008_s16 = smov 0  }
   0xa   :  { %s1010_s17 = smov 0   ;;  %s1012_s18 = smov 0  }
   0xb   :  { %s1014_s19 = smov 0   ;;  %s1016_s20 = smov 0  }
   0xc   :  { %s1018_s21 = smov 0   ;;  %s1020_s22 = smov 0  }
   0xd LB: > { %1220 = sst [smem:[#allocation15_spill]] %s959_s17  ;;  %s1047_s23 = sadd.s32 4294967295, %s979_s22   ;;  %s979_s22 = sphi %s1020_s22, %s27_s22   ;;  %s975_s21 = sphi %s1018_s21, %s1240_s21   ;;  %s971_s20 = sphi %s1016_s20, %s1239_s20   ;;  %s967_s19 = sphi %s1014_s19, %s1238_s19   ;;  %s963_s18 = sphi %s1012_s18, %s1237_s18   ;;  %s959_s17 = sphi %s1010_s17, %s1236_s17   ;;  %s955_s16 = sphi %s1008_s16, %s1242_s16   ;;  %s951_s15 = sphi %s1006_s15, %s1241_s15  }
   0xe   : > { %1221 = sst [smem:[#allocation16_spill]] %s971_s20  ;;  %s629_s24 = sadd.s32 4294967294, %s979_s22  }
   0xf   : > { %1222 = sst [smem:[#allocation17_spill]] %s975_s21  ;;  %s42_s25 = sadd.s32 1, %s971_s20 }
  0x10   : > { %s46_s26 = sadd.s32 1, %s975_s21  ;;  %p44_p0 = scmp.ge.s32.totalorder %s42_s25, 2 }
  0x11   : > { %s57_s27 = sadd.s32 1, %s959_s17  ;;  %p64_p1 = scmp.ne.s32.totalorder %s959_s17, %s955_s16 }
  0x12   : > { %p65_p2 = scmp.eq.s32.totalorder %s979_s22, 0  ;;  %s1244_s25 = smov (%p44_p0, %s42_s25), 0 }
  0x13   : > { %1223 = sst [smem:[#allocation18_spill]] %s1244_s25  ;;  %s1246_s26 = smov (!%p44_p0, %s46_s26), %s975_s21 }
  0x14   : > { %s51_s28 = ssub.s32 %s971_s20, %s1244_s25  ;;  %p1061_p3 = por %p65_p2, %p64_p1 }
  0x15   : > { %p48_p4 = scmp.ge.s32.totalorder %s1246_s26, 2  ;;  %p70_p5 = scmp.ne.s32.totalorder %s955_s16, %s951_s15 }
  0x16   : > { %p71_p6 = scmp.eq.s32.totalorder %s1047_s23, 0  ;;  %p154_p7 = scmp.eq.s32.totalorder %s1047_s23, 3 }
  0x17   : > { %s1248_s26 = smov (%p48_p4, %s1246_s26), 0  ;;  %p160_p10 = scmp.eq.s32.totalorder %s629_s24, 3 }
  0x18   : > { %1225 = sst [smem:[#allocation19_spill]] %s1248_s26  ;;  %p1071_p8 = por %p71_p6, %p70_p5 }
  0x19   : > { %p1075_p9 = por %p154_p7, %p64_p1  ;;  %s50_s6 = ssub.s32 %s975_s21, %s1248_s26 }
  0x1a   : > { %s52_s7 = sor.u32 %s51_s28, %s50_s6  ;;  %p1081_p12 = por %p160_p10, %p70_p5 }
  0x1b   : > { %p55_p11 = scmp.eq.s32.totalorder %s52_s7, 0  ;;  %p685_p13 = scmp.lt.s32.totalorder %s979_s22, 4 }
  0x1c   : > { %s1228_s8 = scalar_select %p1081_p12, 1, 0 }
  0x1d   : > { %s210_s9 = sand.u32 1, %s959_s17   ;;  %s633_s12 = sshll.u32 %s975_s21, 1 }
  0x1e   : > { %1229 = sst [smem:[#allocation20_spill]] %s1228_s8  ;;  %s632_s11 = sshll.u32 %s210_s9, 3 }
  0x1f   : > { %s1088_s10 = scalar_select %p55_p11, %s959_s17, %s57_s27  }
  0x20   : > { %s219_s13 = sadd.s32 %s971_s20, %s633_s12  ;;  %p1094_p0 = pnand %p685_p13, %p1061_p3 }
  0x21   : > { %1230 = sst [smem:[#allocation21_spill]] %s1088_s10  ;;  %s634_s24 = sshll.u32 %s219_s13, 3 }
  0x22   : > { %s232_s28 = sand.u32 1, %s979_s22   ;;  %s1232_s1 = sld [smem:[#allocation22_spill]] }
  0x23   : > { %s236_s8 = scalar_lea.vmem [#allocation5], %s632_s11  ;;  %s233_s21 = scalar_lea.sflag [#allocation6], %s232_s28 }
  0x24   : > { %s246_s27 = sshll.u32 %s236_s8, 4  ;;  %p641_p1 = scmp.ge.s32.totalorder %s979_s22, 1  ;;  %s247_s27 = int_to_ptr.vmem [resolvable:$true] %s246_s27 }
  0x25   : > { %p272_p2 = scmp.lt.s32.totalorder %s979_s22, 5  ;;  %s221_s6 = scalar_lea.hbm %s1208_s0, %s634_s24 }
  0x26   : > { %s214_s7 = scalar_lea.vmem [#allocation2], %s632_s11  ;;  %s211_s8 = scalar_lea.sflag [#allocation3], %s210_s9 }
  0x27   : > { %p1106_p3 = pnand %p641_p1, %p272_p2  ;;  %s257_s10 = scalar_lea.vmem [#allocation7], %s632_s11 }
  0x28   : > { %s242_s26 = scalar_lea.hbm %s1232_s1, %s634_s24  ;;  %s225_s1 = sshll.u32 %s214_s7, 4  ;;  %s226_s1 = int_to_ptr.vmem [resolvable:$true] %s225_s1 }
  0x29   : > { %s244_s25 = sshll.u32 %s242_s26, 4  ;;  %s223_s26 = sshll.u32 %s221_s6, 4  ;;  %s245_s25 = int_to_ptr.hbm [resolvable:$true] %s244_s25  ;;  %s224_s26 = int_to_ptr.hbm [resolvable:$true] %s223_s26 }
  0x2a   : > { %674 = dma.hbm_to_vmem [thread:$0]  (!%p1094_p0), %s245_s25, 128, %s247_s27, %s233_s21  }
  0x2b   : > { %671 = dma.hbm_to_vmem [thread:$0]  (!%p1094_p0), %s224_s26, 128, %s226_s1, %s211_s8  }
  0x2c   : > { %s263_s27 = scalar_lea.hbm %s1210_s2, %s634_s24  ;;  %s267_s17 = sshll.u32 %s257_s10, 4  ;;  %s268_s17 = int_to_ptr.vmem [resolvable:$true] %s267_s17 }
  0x2d   : > { %s265_s20 = sshll.u32 %s263_s27, 4  ;;  %276 = sbr.rel (%p1106_p3) target bundleno = 573 (0x23d), region = 32  ;;  %s266_s20 = int_to_ptr.hbm [resolvable:$true] %s265_s20 }
  0x2e   : > { %677 = dma.hbm_to_vmem [thread:$0]  (!%p1094_p0), %s266_s20, 128, %s268_s17, %s233_s21  }
  0x2f   : > { %s1123_s12 = sand.u32 (!%p1106_p3), 1, %s955_s16  }
  0x30   : > { %s1126_s1 = sshll.u32 (!%p1106_p3), %s1123_s12, 3  ;;  %s279_s9 = scalar_lea.sflag (!%p1106_p3), [#allocation3], %s1123_s12 }
  0x31   : > { %s282_s24 = scalar_lea.vmem (!%p1106_p3), [#allocation2], %s1126_s1 }
  0x32   : > { %934 = dma.done.wait (%p1071_p8), %s279_s9, 128  }
  0x33   : > { %936 = vsyncadd (%p1071_p8), %s279_s9, 4294967168  ;;  %s288_s17 = sand.u32 1, %s1047_s23   ;;  %s292_s21 = scalar_lea.vmem [#allocation5], %s1126_s1 }
  0x34   : > { %s289_s20 = scalar_lea.sflag [#allocation6], %s288_s17 }
  0x35   : > { %938 = dma.done.wait (%p1071_p8), %s289_s20, 256  }
  0x36   : > { %940 = vsyncadd (%p1071_p8), %s289_s20, 4294967040  ;;  %vm346_vm0 = vcmask 130048   ;;  %v345_v0 = vld [vmem:[%s292_s21] sm:$0xff]  ;;  %v343_v1 = vld [vmem:[%s282_s24] sm:$0xff]  ;;  %vm373_vm1 = vcmask 64512   ;;  %s302_s23 = scalar_lea.vmem [#allocation7], %s1126_s1 }
  0x37   : > { %647 = vmatpush.xpose.msk.msra.mxu0 %vm346_vm0, %v345_v0  ;;  %v344_v2 = vmul.f32 0.25, %v343_v1  ;;  %v389_v10 = vld [vmem:[%s302_s23] sm:$0xff]  ;;  %s652_s30 = sshll.u32 %s967_s19, 1  ;;  %s342_s6 = scalar_lea.vmem [#allocation9], %s1126_s1 }
  0x38   : > { %408 = vmatpush.msra.mxu1 %v389_v10  ;;  %s431_s10 = sadd.s32 %s963_s18, %s652_s30  ;;  %s452_s26 = sshll.u32 %s342_s6, 4  ;;  %s453_s26 = int_to_ptr.vmem [resolvable:$true] %s452_s26 }
  0x39   : > { %s653_s11 = sshll.u32 %s431_s10, 3  ;;  %s420_s19 = scalar_lea.sflag [#allocation10], %s1123_s12 }
  0x3a   : > { %648 = vmatmul.msk.f32.vlgmr.msra.gmra.mxu0 %vm346_vm0, %v344_v2  ;;  %s450_s13 = scalar_lea.hbm %s1212_s4, %s653_s11  ;;  %s865_s27 = scalar_lea.hbm %s1212_s4, 32 }
  0x3b   : > { %s454_s7 = sshll.u32 %s450_s13, 4  ;;  %s455_s7 = int_to_ptr.hbm [resolvable:$true] %s454_s7 }
  0x3c   : > { %s859_s8 = sshra.s32 %s455_s7, 4  ;;  %s860_s8 = int_to_ptr.hbm [resolvable:$true] %s859_s8 }
  0x3d   : > { %s861_s18 = scalar_lea.hbm %s860_s8, 8  ;;  %p866_p7 = scmp.lt.s32.totalorder %s860_s8, %s1212_s4 }
  0x3e   : > { %p862_p4 = scmp.ne.s32.totalorder %s860_s8, %s861_s18  ;;  %p867_p8 = scmp.lt.s32.totalorder %s865_s27, %s861_s18 }
  0x40   : > { %p863_p5 = pnand %p862_p4, %p1075_p9  ;;  %p868_p10 = por %p867_p8, %p866_p7 }
  0x42   : > { %p864_p6 = pneg %p863_p5 }
  0x44   : > { %p869_p11 = pnand %p868_p10, %p864_p6 }
  0xb7   : > { %v370_v3 = vpop.f32.mrf.mxu0 }
  0xb8   : > { %v374_v4 = vsel %vm373_vm1, %v370_v3, -inf }
  0xb9   : > { %375 = vmax.xlane.f32.xlu0 %v374_v4 }
 0x12c   : > { %v376_v5 = vpop.xlane.xlu0 %375 }
 0x12d   : > { %v377_v6 = vsub.f32 %v370_v3, %v376_v5 }
 0x12f   : > { %v378_v7 = vmul.f32 1.442695, %v377_v6 }
 0x131   : > { %751 = vpow2.f32 %v378_v7 }
 0x137   : > { %v752_v8 = vpop.eup %751 }
 0x138   : > { %v380_v9 = vsel %vm373_vm1, %v752_v8, 0.0 }
 0x139   : > { %381 = vadd.xlane.f32.xlu0 %v380_v9 }
 0x1ac   : > { %v382_v11 = vpop.xlane.xlu0 %381 }
 0x1ad   : > { %753 = vrcp.f32 %v382_v11 }
 0x1b3   : > { %v754_v12 = vpop.eup %753 }
 0x1b4   : > { %v384_v13 = vmul.f32 %v754_v12, %v382_v11 }
 0x1b6   : > { %v385_v14 = vsub.f32 2.0, %v384_v13 }
 0x1b8   : > { %v386_v15 = vmul.f32 %v754_v12, %v385_v14 }
 0x1ba   : > { %v387_v16 = vmul.f32 %v752_v8, %v386_v15 }
 0x1bc   : > { %649 = vmatmul.msk.f32.vlgmr.msra.gmra.mxu1 %vm373_vm1, %v387_v16  ;;  %388 = vst.msk [vmem:[%s342_s6] sm:$0xff] %vm373_vm1, %v387_v16 }
 0x1bd   : > { %872 = shalt.err (!%p869_p11)
}
 0x1be   : > { %665 = dma.vmem_to_hbm [thread:$0]  (%p1075_p9), %s453_s26, 128, %s455_s7, %s420_s19  }
 0x1bf   : > { %s433_s21 = scalar_lea.hbm %s1211_s3, %s653_s11  ;;  %s335_s23 = scalar_lea.vmem [#allocation8], %s1126_s1 }
 0x1c0   : > { %s435_s30 = sshll.u32 %s335_s23, 4  ;;  %s437_s10 = sshll.u32 %s433_s21, 4  ;;  %s436_s30 = int_to_ptr.vmem [resolvable:$true] %s435_s30  ;;  %s438_s10 = int_to_ptr.hbm [resolvable:$true] %s437_s10 }
 0x1c1   : > { %s415_s14 = scalar_lea.sflag [#allocation4], %s1123_s12  ;;  %s887_s29 = sshra.s32 %s438_s10, 4  ;;  %s888_s29 = int_to_ptr.hbm [resolvable:$true] %s887_s29 }
 0x1c2   : > { %s889_s13 = scalar_lea.hbm %s888_s29, 8  ;;  %s893_s11 = scalar_lea.hbm %s1211_s3, 32 }
 0x1c3   : > { %p890_p13 = scmp.ne.s32.totalorder %s888_s29, %s889_s13  ;;  %p894_p2 = scmp.lt.s32.totalorder %s888_s29, %s1211_s3 }
 0x1c4   : > { %p895_p3 = scmp.lt.s32.totalorder %s893_s11, %s889_s13 }
 0x1c5   : > { %p891_p0 = pnand %p890_p13, %p1075_p9 }
 0x1c6   : > { %p896_p4 = por %p895_p3, %p894_p2 }
 0x1c7   : > { %p892_p1 = pneg %p891_p0 }
 0x1c9   : > { %p897_p5 = pnand %p896_p4, %p892_p1 }
 0x239   : > { %v410_v17 = vpop.f32.mrf.mxu1 }
 0x23a   : > { %413 = vst.msk [vmem:[%s335_s23] sm:$0xff] %vm346_vm0, %v410_v17 }
 0x23b   : > { %900 = shalt.err (!%p897_p5)
}
 0x23c   : > { %664 = dma.vmem_to_hbm [thread:$0]  (%p1075_p9), %s436_s30, 128, %s438_s10, %s415_s14  }
 0x23d PF: > { %p686_p6 = scmp.ge.s32.totalorder %s979_s22, 2  ;;  %s466_s19 = sand.u32 1, %s951_s15  }
 0x23e   : > { %s467_s8 = scalar_lea.sflag [#allocation4], %s466_s19 }
 0x23f   : > { %p679_p7 = pnand %p686_p6, %p1081_p12 }
 0x241   : > { %p680_p8 = pneg %p679_p7 }
 0x243   : > { %942 = dma.done.wait (%p680_p8), %s467_s8, 128  }
 0x244   : > { %944 = vsyncadd (%p680_p8), %s467_s8, 4294967168  ;;  %s477_s18 = scalar_lea.sflag [#allocation10], %s466_s19 }
 0x245   : > { %946 = dma.done.wait (%p680_p8), %s477_s18, 128  }
 0x246   : > { %948 = vsyncadd (%p680_p8), %s477_s18, 4294967168  ;;  %s27_s22 = sadd.s32 1, %s979_s22   ;;  %s1235_s5 = sld [smem:[#allocation15_spill]] }
 0x247   : > { %p24_p10 = scmp.ge.s32.totalorder %s27_s22, 6   ;;  %s1236_s17 = sld [smem:[#allocation21_spill]] }
 0x248   : > { %s1237_s18 = sld [smem:[#allocation16_spill]]  ;;  %s1241_s15 = smov %s955_s16 }
 0x249   : > { %s1238_s19 = sld [smem:[#allocation17_spill]]  ;;  %26 = sbr.rel (!%p24_p10) target bundleno = 13 (0xd), region = 118 }
 0x24a   : > { %s1239_s20 = sld [smem:[#allocation18_spill]] }
 0x24b   : > { %s1240_s21 = sld [smem:[#allocation19_spill]] }
 0x24c   : > { %s1242_s16 = smov %s1235_s5 }
 0x24e   :  { %483 = vsyncpa [#allocation3], 1 }
 0x24f   :  { %485 = vsyncpa [#allocation3 + $0x1], 1 }
 0x250   :  { %486 = vsyncpa [#allocation6], 1 }
 0x251   :  { %488 = vsyncpa [#allocation6 + $0x1], 1 }
 0x252   :  { %489 = vsyncpa [#allocation4], 1 }
 0x253   :  { %491 = vsyncpa [#allocation4 + $0x1], 1 }
 0x254   :  { %492 = vsyncpa [#allocation10], 1 }
 0x255   :  { %494 = vsyncpa [#allocation10 + $0x1], 1 }

</bundles_post_ra>
